<compile_context>
chip_gen: v6e
topology: v6e:2x2x1
jax: 0.10.0
libtpu: 0.0.40
codegen_flags: <defaults>
</compile_context>

<pallas_src>
import functools

import jax
import jax.numpy as jnp
from jax.experimental import pallas as pl
from jax.experimental.pallas import tpu as pltpu  # noqa: F401  (see scaling note above)


def _area_kernel(x_ref, out_ref, *, n_pts):
    """All surfaces' mean squared pairwise distance in one grid step.

    x_ref:   (S, N, D) block — all evaluation points, natural layout.
    out_ref: (1, S)    block — lane-dense per-surface results, written once.
    """
    x = x_ref[...]                                          # (S, N, D) float32
    inv_n = jnp.float32(1.0 / n_pts)

    # Centered identity: mean_{i,j} ||x_i - x_j||^2 = (2/N) * sum_i ||x_i - xbar||^2
    mean = jnp.sum(x, axis=1, keepdims=True) * inv_n        # (S, 1, D) sublane reduce
    c = x - mean                                            # centered (conditioning)
    per_pt = jnp.sum(c * c, axis=-1)                        # (S, N)    lane reduce
    total = jnp.sum(per_pt, axis=-1)                        # (S,)      lane reduce

    out_ref[...] = ((2.0 * inv_n) * total).reshape(1, -1)   # single lane-dense store


def mean_pairwise_sqdist(pts):
    """pts: (S, N, D) float32 -> (S,) mean of each N x N squared-distance matrix."""
    S, N, D = pts.shape
    out = pl.pallas_call(
        functools.partial(_area_kernel, n_pts=N),
        out_shape=jax.ShapeDtypeStruct((1, S), jnp.float32),
        # Single step: block shapes equal the full array shapes (satisfies the
        # (8,128) rule via the "equal to full dims" clause); no grid loop at all.
        in_specs=[pl.BlockSpec((S, N, D), lambda: (0, 0, 0))],
        out_specs=pl.BlockSpec((1, S), lambda: (0, 0)),
    )(pts)
    return out[0]


def compute_areas(surface_pts):
    """surface_pts: (S, N, D) -> proportional areas, shape (S,)."""
    all_areas = mean_pairwise_sqdist(surface_pts)           # Pallas hot path
    # NOTE: degenerate input (all surfaces collapsed to a point) -> NaN,
    # matching the PyTorch reference semantics.
    return all_areas / jnp.max(all_areas)                   # tiny glue, plain JAX


class AreaLoss:
    """JAX/Pallas equivalent of the PyTorch AreaLoss module."""

    def __init__(self, initial_surface_pts):
        self.initial_area = compute_areas(initial_surface_pts)

    def __call__(self, surface_pts):
        current_areas = compute_areas(surface_pts)
        diff = self.initial_area - current_areas
        return jnp.mean(diff ** 2)


# ---- pure-JAX reference (direct N x N pairwise form) for verification ----
def _ref_mean_sqdist(pts):
    d = pts[:, :, None, :] - pts[:, None, :, :]              # (S, N, N, D)
    return jnp.mean(jnp.sum(d * d, axis=-1), axis=(1, 2))


def _ref_loss(init_pts, cur_pts):
    a0 = _ref_mean_sqdist(init_pts)
    a0 = a0 / jnp.max(a0)
    a1 = _ref_mean_sqdist(cur_pts)
    a1 = a1 / jnp.max(a1)
    return jnp.mean((a0 - a1) ** 2)


if __name__ == "__main__":
    key = jax.random.PRNGKey(0)
    S, N, D = 3, 64, 3  # 3 surfaces, 64 evaluation points each, 3-D points

    k1, k2 = jax.random.split(key)
    # "surface()" evaluation points, built deterministically in-script.
    init_pts = jax.random.normal(k1, (S, N, D), dtype=jnp.float32)
    cur_pts = init_pts + 0.1 * jax.random.normal(k2, (S, N, D), dtype=jnp.float32)

    loss_mod = AreaLoss(init_pts)
    loss = loss_mod(cur_pts)
    loss = jax.block_until_ready(loss)

    ref = jax.block_until_ready(_ref_loss(init_pts, cur_pts))
    assert jnp.allclose(loss, ref, rtol=1e-5, atol=1e-6), (loss, ref)

    print("KERNEL_OK")
</pallas_src>

<mosaic_0001>
module attributes {stable_mosaic.version = 11 : i64} {
  func.func @_area_kernel(%arg0: memref<3x64x3xf32, #tpu.memory_space<vmem>>, %arg1: memref<1x3xf32, #tpu.memory_space<vmem>>) attributes {dimension_semantics = [], scalar_prefetch = 0 : i64, scratch_operands = 0 : i64, tpu.core_type = #tpu.core_type<tc>} {
    %c0 = arith.constant 0 : index
    %c0_0 = arith.constant 0 : index
    %c0_1 = arith.constant 0 : index
    %0 = vector.load %arg0[%c0, %c0_0, %c0_1] : memref<3x64x3xf32, #tpu.memory_space<vmem>>, vector<3x64x3xf32>
    %cst = arith.constant dense<0.000000e+00> : vector<3x3xf32>
    %1 = vector.multi_reduction <add>, %0, %cst [1] : vector<3x64x3xf32> to vector<3x3xf32>
    %2 = vector.shape_cast %1 : vector<3x3xf32> to vector<3x1x3xf32>
    %cst_2 = arith.constant 1.562500e-02 : f32
    %3 = vector.broadcast %cst_2 : f32 to vector<3x1x3xf32>
    %4 = arith.mulf %2, %3 : vector<3x1x3xf32>
    %5 = vector.broadcast %4 : vector<3x1x3xf32> to vector<3x64x3xf32>
    %6 = arith.subf %0, %5 : vector<3x64x3xf32>
    %7 = arith.mulf %6, %6 : vector<3x64x3xf32>
    %cst_3 = arith.constant dense<0.000000e+00> : vector<3x64xf32>
    %8 = vector.multi_reduction <add>, %7, %cst_3 [2] : vector<3x64x3xf32> to vector<3x64xf32>
    %cst_4 = arith.constant dense<0.000000e+00> : vector<3xf32>
    %9 = vector.multi_reduction <add>, %8, %cst_4 [1] : vector<3x64xf32> to vector<3xf32>
    %cst_5 = arith.constant 2.000000e+00 : f32
    %cst_6 = arith.constant 1.562500e-02 : f32
    %10 = arith.mulf %cst_5, %cst_6 : f32
    %11 = vector.broadcast %10 : f32 to vector<3xf32>
    %12 = arith.mulf %11, %9 : vector<3xf32>
    %13 = vector.shape_cast %12 : vector<3xf32> to vector<1x3xf32>
    %c0_7 = arith.constant 0 : index
    %c0_8 = arith.constant 0 : index
    %14 = vector.load %arg1[%c0_7, %c0_8] : memref<1x3xf32, #tpu.memory_space<vmem>>, vector<1x3xf32>
    tpu.vector_store %arg1[%c0_7, %c0_8], %13 {strides = array<i32>} : memref<1x3xf32, #tpu.memory_space<vmem>>, vector<1x3xf32>,
    return
  }
}

</mosaic_0001>

<bundles_post_ra>
// kernel: tpu_custom_call.1
= control target key start
LH: loop header
LB: loop body
LE: loop exit
PB: predicated region body
PF: predicated region fallthrough
CT: control target
= control target key end

     0   :  { %vm33_vm0 = vcmask 23552   ;;  %s743_s0 = inlined_call_operand.vmem [shape: f32[3,64,3], index: 0, kind: input, shape index: {}]   ;;  %s744_s1 = inlined_call_operand.hbm [shape: f32[1,3], index: 1, kind: output, shape index: {}]  }
   0x1   :  { %v446_v0 = vld [vmem:[%s743_s0 + $0x40] sm:$0xff]  ;;  %v451_v1 = vld [vmem:[%s743_s0 + $0x48] sm:$0xff]  ;;  %v456_v2 = vld [vmem:[%s743_s0 + $0x50] sm:$0xff] }
   0x2   :  { %v461_v3 = vld [vmem:[%s743_s0 + $0x58] sm:$0xff]  ;;  %v55_v4 = vsel %vm33_vm0, %v446_v0, 0.0  ;;  %v56_v5 = vsel %vm33_vm0, %v451_v1, 0.0  ;;  %v58_v6 = vsel %vm33_vm0, %v456_v2, 0.0  ;;  %v472_v7 = vld [vmem:[%s743_s0 + $0x60] sm:$0xff]  ;;  %v484_v11 = vld [vmem:[%s743_s0 + $0x8] sm:$0xff] }
   0x3   :  { %v57_v8 = vadd.f32 %v56_v5, %v55_v4  ;;  %v477_v9 = vld [vmem:[%s743_s0] sm:$0xff]  ;;  %v60_v10 = vsel %vm33_vm0, %v461_v3, 0.0  ;;  %v489_v12 = vld [vmem:[%s743_s0 + $0x10] sm:$0xff]  ;;  %v494_v13 = vld [vmem:[%s743_s0 + $0x18] sm:$0xff]  ;;  %v35_v17 = vsel %vm33_vm0, %v484_v11, 0.0  ;;  %v62_v19 = vsel %vm33_vm0, %v472_v7, 0.0 }
   0x4   :  { %v34_v14 = vsel %vm33_vm0, %v477_v9, 0.0  ;;  %v501_v15 = vld [vmem:[%s743_s0 + $0x68] sm:$0xff]  ;;  %v37_v18 = vsel %vm33_vm0, %v489_v12, 0.0  ;;  %v512_v20 = vld [vmem:[%s743_s0 + $0x20] sm:$0xff]  ;;  %v527_v24 = vld [vmem:[%s743_s0 + $0x70] sm:$0xff]  ;;  %v39_v26 = vsel %vm33_vm0, %v494_v13, 0.0 }
   0x5   :  { %v59_v16 = vadd.f32 %v58_v6, %v57_v8  ;;  %v36_v21 = vadd.f32 %v35_v17, %v34_v14  ;;  %v517_v22 = vld [vmem:[%s743_s0 + $0x80] sm:$0xff]  ;;  %v522_v23 = vld [vmem:[%s743_s0 + $0x88] sm:$0xff]  ;;  %v534_v27 = vld [vmem:[%s743_s0 + $0x90] sm:$0xff]  ;;  %v64_v31 = vsel %vm33_vm0, %v501_v15, 0.0  ;;  %v41_v39 = vsel %vm33_vm0, %v512_v20, 0.0 }
   0x6   :  { %v539_v28 = vld [vmem:[%s743_s0 + $0x98] sm:$0xff]  ;;  %v76_v29 = vsel %vm33_vm0, %v517_v22, 0.0  ;;  %v77_v30 = vsel %vm33_vm0, %v522_v23, 0.0  ;;  %v550_v32 = vld [vmem:[%s743_s0 + $0x28] sm:$0xff]  ;;  %v555_v34 = vld [vmem:[%s743_s0 + $0xa0] sm:$0xff]  ;;  %v79_v36 = vsel %vm33_vm0, %v534_v27, 0.0 }
   0x7   :  { %v61_v25 = vadd.f32 %v60_v10, %v59_v16  ;;  %v38_v33 = vadd.f32 %v37_v18, %v36_v21  ;;  %v78_v35 = vadd.f32 %v77_v30, %v76_v29  ;;  %v562_v37 = vld [vmem:[%s743_s0 + $0x78] sm:$0xff]  ;;  %v81_v40 = vsel %vm33_vm0, %v539_v28, 0.0 }
   0x9   :  { %v63_v38 = vadd.f32 %v62_v19, %v61_v25 }
   0xa   :  { %6 = vsyncpa [#allocation3], 0  ;;  %v66_v41 = vsel %vm33_vm0, %v527_v24, 0.0  ;;  %v573_v42 = vld [vmem:[%s743_s0 + $0x30] sm:$0xff]  ;;  %v40_v43 = vadd.f32 %v39_v26, %v38_v33  ;;  %v578_v44 = vld [vmem:[%s743_s0 + $0xa8] sm:$0xff]  ;;  %v80_v45 = vadd.f32 %v79_v36, %v78_v35  ;;  %v43_v47 = vsel %vm33_vm0, %v550_v32, 0.0 }
   0xb   :  { %v65_v46 = vadd.f32 %v64_v31, %v63_v38  ;;  %v83_v48 = vsel %vm33_vm0, %v555_v34, 0.0  ;;  %v68_v49 = vsel %vm33_vm0, %v562_v37, 0.0  ;;  %v589_v50 = vld [vmem:[%s743_s0 + $0x38] sm:$0xff]  ;;  %v594_v52 = vld [vmem:[%s743_s0 + $0xb0] sm:$0xff]  ;;  %v45_v55 = vsel %vm33_vm0, %v573_v42, 0.0 }
   0xc   :  { %v42_v51 = vadd.f32 %v41_v39, %v40_v43  ;;  %v82_v53 = vadd.f32 %v81_v40, %v80_v45  ;;  %v85_v56 = vsel %vm33_vm0, %v578_v44, 0.0  ;;  %v603_v58 = vld [vmem:[%s743_s0 + $0xb8] sm:$0xff]  ;;  %v47_v61 = vsel %vm33_vm0, %v589_v50, 0.0  ;;  %s432_s0 = smov [#allocation2]  }
   0xd   :  { %v67_v54 = vadd.f32 %v66_v41, %v65_v46  ;;  %v87_v62 = vsel %vm33_vm0, %v594_v52, 0.0  ;;  %v89_v6 = vsel %vm33_vm0, %v603_v58, 0.0  ;;  %vm255_vm1 = vcmask 130112   ;;  %s401_s25 = sshll.u32 %s432_s0, 4  ;;  %s402_s25 = int_to_ptr.vmem [resolvable:$true] %s401_s25 }
   0xe   :  { %v44_v57 = vadd.f32 %v43_v47, %v42_v51  ;;  %v84_v59 = vadd.f32 %v83_v48, %v82_v53  ;;  %vm262_vm2 = vcmask 195712   ;;  %vm269_vm3 = vcmask 261312   ;;  %s410_s26 = scalar_lea.vmem %s402_s25, 16  ;;  %s414_s27 = scalar_lea.vmem %s402_s25, 32 }
   0xf   :  { %v69_v60 = vadd.f32 %v68_v49, %v67_v54  ;;  %vm276_vm4 = vcmask 326912   ;;  %vm283_vm5 = vcmask 392512   ;;  %vm290_vm6 = vcmask 458112   ;;  %p411_p0 = scmp.ne.s32.totalorder %s402_s25, %s410_s26  ;;  %p415_p1 = scmp.lt.s32.totalorder %s402_s25, %s402_s25 }
  0x10   :  { %v46_v63 = vadd.f32 %v45_v55, %v44_v57  ;;  %v86_v4 = vadd.f32 %v85_v56, %v84_v59  ;;  %vm297_vm7 = vcmask 523712   ;;  %vm377_vm8 = vcmask 1041409   ;;  %p416_p2 = scmp.lt.s32.totalorder %s414_s27, %s410_s26 }
  0x11   :  { %v70_v5 = vrot.slane %v69_v60, 4  ;;  %vm379_vm9 = vcmask 1042434   ;;  %vm382_vm10 = vcmask 518144   ;;  %vm393_vm11 = vcmask 16384  }
  0x12   :  { %v48_v8 = vadd.f32 %v47_v61, %v46_v63  ;;  %v88_v10 = vadd.f32 %v87_v62, %v86_v4  ;;  %p417_p3 = por %p416_p2, %p415_p1 }
  0x13   :  { %v71_v14 = vadd.f32 %v70_v5, %v69_v60 }
  0x14   :  { %v49_v16 = vrot.slane %v48_v8, 4  ;;  %v90_v17 = vadd.f32 %v89_v6, %v88_v10  ;;  %p418_p4 = pnand %p417_p3, %p411_p0 }
  0x15   :  { %v72_v18 = vrot.slane %v71_v14, 2 }
  0x16   :  { %v50_v19 = vadd.f32 %v49_v16, %v48_v8  ;;  %v91_v21 = vrot.slane %v90_v17, 4 }
  0x17   :  { %v73_v25 = vadd.f32 %v72_v18, %v71_v14 }
  0x18   :  { %v51_v26 = vrot.slane %v50_v19, 2  ;;  %v92_v29 = vadd.f32 %v91_v21, %v90_v17 }
  0x19   :  { %v74_v30 = vrot.slane %v73_v25, 1 }
  0x1a   :  { %v52_v31 = vadd.f32 %v51_v26, %v50_v19  ;;  %v93_v33 = vrot.slane %v92_v29, 2 }
  0x1b   :  { %v75_v35 = vadd.f32 %v74_v30, %v73_v25 }
  0x1c   :  { %v53_v36 = vrot.slane %v52_v31, 1  ;;  %v94_v38 = vadd.f32 %v93_v33, %v92_v29 }
  0x1d   :  { %v611_v39 = vmul.f32 0.015625, %v75_v35 }
  0x1e   :  { %v54_v40 = vadd.f32 %v53_v36, %v52_v31  ;;  %v95_v41 = vrot.slane %v94_v38, 1 }
  0x1f   :  { %v108_v43 = vsub.f32 %v446_v0, %v611_v39  ;;  %v109_v45 = vsub.f32 %v451_v1, %v611_v39  ;;  %v110_v51 = vsub.f32 %v456_v2, %v611_v39 }
  0x20   :  { %v617_v46 = vmul.f32 0.015625, %v54_v40  ;;  %v96_v47 = vadd.f32 %v95_v41, %v94_v38 }
  0x21   :  { %v132_v48 = vmul.f32 %v108_v43, %v108_v43  ;;  %v133_v49 = vmul.f32 %v109_v45, %v109_v45  ;;  %v134_v60 = vmul.f32 %v110_v51, %v110_v51 }
  0x22   :  { %v100_v53 = vsub.f32 %v477_v9, %v617_v46  ;;  %v101_v54 = vsub.f32 %v484_v11, %v617_v46  ;;  %v625_v55 = vmul.f32 0.015625, %v96_v47  ;;  %v102_v57 = vsub.f32 %v489_v12, %v617_v46 }
  0x23   :  { %v172_v0 = vsel %vm33_vm0, %v132_v48, 0.0  ;;  %v175_v59 = vsel %vm33_vm0, %v133_v49, 0.0  ;;  %v178_v63 = vsel %vm33_vm0, %v134_v60, 0.0  ;;  %v111_v12 = vsub.f32 %v461_v3, %v611_v39 }
  0x24   :  { %173 = vadd.xlane.f32.xlu1 %v172_v0  ;;  %v124_v1 = vmul.f32 %v100_v53, %v100_v53  ;;  %v125_v56 = vmul.f32 %v101_v54, %v101_v54  ;;  %v117_v2 = vsub.f32 %v522_v23, %v625_v55  ;;  %v126_v61 = vmul.f32 %v102_v57, %v102_v57 }
  0x25   :  { %v116_v62 = vsub.f32 %v517_v22, %v625_v55  ;;  %v103_v6 = vsub.f32 %v494_v13, %v617_v46  ;;  %v135_v10 = vmul.f32 %v111_v12, %v111_v12  ;;  %v104_v22 = vsub.f32 %v512_v20, %v617_v46 }
  0x26   :  { %v148_v9 = vsel %vm33_vm0, %v124_v1, 0.0  ;;  %v151_v11 = vsel %vm33_vm0, %v125_v56, 0.0  ;;  %v141_v4 = vmul.f32 %v117_v2, %v117_v2  ;;  %v154_v23 = vsel %vm33_vm0, %v126_v61, 0.0 }
  0x27   :  { %149 = vadd.xlane.f32.xlu0 %v148_v9  ;;  %v140_v5 = vmul.f32 %v116_v62, %v116_v62  ;;  %v127_v16 = vmul.f32 %v103_v6, %v103_v6  ;;  %v118_v3 = vsub.f32 %v534_v27, %v625_v55  ;;  %v181_v17 = vsel %vm33_vm0, %v135_v10, 0.0 }
  0x28   :  { %176 = vadd.xlane.f32.xlu1 %v175_v59  ;;  %v199_v8 = vsel %vm33_vm0, %v141_v4, 0.0  ;;  %v128_v18 = vmul.f32 %v104_v22, %v104_v22  ;;  %v119_v13 = vsub.f32 %v539_v28, %v625_v55  ;;  %v112_v20 = vsub.f32 %v472_v7, %v611_v39 }
  0x29   :  { %v196_v14 = vsel %vm33_vm0, %v140_v5, 0.0  ;;  %v157_v19 = vsel %vm33_vm0, %v127_v16, 0.0  ;;  %v142_v21 = vmul.f32 %v118_v3, %v118_v3  ;;  %v113_v27 = vsub.f32 %v501_v15, %v611_v39 }
  0x2a   :  { %v160_v25 = vsel %vm33_vm0, %v128_v18, 0.0  ;;  %v143_v26 = vmul.f32 %v119_v13, %v119_v13  ;;  %v136_v30 = vmul.f32 %v112_v20, %v112_v20  ;;  %v105_v28 = vsub.f32 %v550_v32, %v617_v46 }
  0x2b   :  { %152 = vadd.xlane.f32.xlu0 %v151_v11  ;;  %v202_v29 = vsel %vm33_vm0, %v142_v21, 0.0  ;;  %v137_v33 = vmul.f32 %v113_v27, %v113_v27  ;;  %v106_v7 = vsub.f32 %v573_v42, %v617_v46  ;;  %v120_v15 = vsub.f32 %v555_v34, %v625_v55 }
  0x2c   :  { %179 = vadd.xlane.f32.xlu1 %v178_v63  ;;  %v205_v31 = vsel %vm33_vm0, %v143_v26, 0.0  ;;  %v184_v35 = vsel %vm33_vm0, %v136_v30, 0.0  ;;  %v129_v36 = vmul.f32 %v105_v28, %v105_v28  ;;  %v121_v32 = vsub.f32 %v578_v44, %v625_v55 }
  0x2d   :  { %v187_v38 = vsel %vm33_vm0, %v137_v33, 0.0  ;;  %v130_v40 = vmul.f32 %v106_v7, %v106_v7  ;;  %v144_v43 = vmul.f32 %v120_v15, %v120_v15  ;;  %v114_v42 = vsub.f32 %v527_v24, %v611_v39 }
  0x2e   :  { %v163_v41 = vsel %vm33_vm0, %v129_v36, 0.0  ;;  %v145_v47 = vmul.f32 %v121_v32, %v121_v32  ;;  %v115_v34 = vsub.f32 %v562_v37, %v611_v39  ;;  %v107_v44 = vsub.f32 %v589_v50, %v617_v46 }
  0x2f   :  { %155 = vadd.xlane.f32.xlu0 %v154_v23  ;;  %v166_v45 = vsel %vm33_vm0, %v130_v40, 0.0  ;;  %v208_v48 = vsel %vm33_vm0, %v144_v43, 0.0  ;;  %v138_v49 = vmul.f32 %v114_v42, %v114_v42  ;;  %v123_v24 = vsub.f32 %v603_v58, %v625_v55 }
  0x30   :  { %200 = vadd.xlane.f32.xlu1 %v199_v8  ;;  %v211_v51 = vsel %vm33_vm0, %v145_v47, 0.0  ;;  %v139_v53 = vmul.f32 %v115_v34, %v115_v34  ;;  %v131_v0 = vmul.f32 %v107_v44, %v107_v44  ;;  %v122_v37 = vsub.f32 %v594_v52, %v625_v55 }
  0x31   :  { %v190_v54 = vsel %vm33_vm0, %v138_v49, 0.0  ;;  %v147_v1 = vmul.f32 %v123_v24, %v123_v24  ;;  %v244_v4 = vlaneseq }
  0x32   :  { %v193_v39 = vsel %vm33_vm0, %v139_v53, 0.0  ;;  %v169_v50 = vsel %vm33_vm0, %v131_v0, 0.0  ;;  %v146_v46 = vmul.f32 %v122_v37, %v122_v37 }
  0x33   :  { %197 = vadd.xlane.f32.xlu0 %v196_v14  ;;  %v217_v56 = vsel %vm33_vm0, %v147_v1, 0.0  ;;  %v245_v5 = vand.u32 127, %v244_v4  ;;  %v247_v14 = vshrl.u32 %v244_v4, 7 }
  0x34   :  { %182 = vadd.xlane.f32.xlu1 %v181_v17  ;;  %v214_v58 = vsel %vm33_vm0, %v146_v46, 0.0 }
  0x35   :  { %v250_v6 = vadd.s32 4294967288, %v245_v5  ;;  %v257_v10 = vadd.s32 4294967280, %v245_v5  ;;  %v264_v3 = vadd.s32 4294967272, %v245_v5  ;;  %v271_v21 = vadd.s32 4294967264, %v245_v5 }
  0x36   :  { %v278_v20 = vadd.s32 4294967256, %v245_v5  ;;  %v292_v30 = vadd.s32 4294967240, %v245_v5 }
  0x37   :  { %158 = vadd.xlane.f32.xlu0 %v157_v19  ;;  %v253_v16 = vsub.s32 %v250_v6, %v247_v14  ;;  %v260_v18 = vsub.s32 %v257_v10, %v247_v14  ;;  %v705_v19 = vsub.s32 %v245_v5, %v247_v14  ;;  %v267_v27 = vsub.s32 %v264_v3, %v247_v14 }
  0x38   :  { %161 = vadd.xlane.f32.xlu1 %v160_v25  ;;  %v285_v25 = vadd.s32 4294967248, %v245_v5  ;;  %v281_v36 = vsub.s32 %v278_v20, %v247_v14  ;;  %v295_v42 = vsub.s32 %v292_v30, %v247_v14 }
  0x3a   :  { %v288_v40 = vsub.s32 %v285_v25, %v247_v14 }
  0x3b   :  { %203 = vadd.xlane.f32.xlu0 %v202_v29 }
  0x3c   :  { %206 = vadd.xlane.f32.xlu1 %v205_v31 }
  0x3f   :  { %185 = vadd.xlane.f32.xlu0 %v184_v35  ;;  %v274_v35 = vsub.s32 %v271_v21, %v247_v14 }
  0x40   :  { %188 = vadd.xlane.f32.xlu1 %v187_v38 }
  0x43   :  { %164 = vadd.xlane.f32.xlu0 %v163_v41 }
  0x44   :  { %167 = vadd.xlane.f32.xlu1 %v166_v45 }
  0x47   :  { %209 = vadd.xlane.f32.xlu0 %v208_v48 }
  0x48   :  { %212 = vadd.xlane.f32.xlu1 %v211_v51 }
  0x4b   :  { %191 = vadd.xlane.f32.xlu0 %v190_v54 }
  0x4c   :  { %194 = vadd.xlane.f32.xlu1 %v193_v39 }
  0x4f   :  { %170 = vadd.xlane.f32.xlu0 %v169_v50 }
  0x50   :  { %218 = vadd.xlane.f32.xlu1 %v217_v56 }
  0x53   :  { %215 = vadd.xlane.f32.xlu0 %v214_v58 }
  0xad   :  { %v174_v57 = vpop.xlane.xlu1 %173 }
  0xae   :  { %v302_v7 = vrot.slane %v174_v57, %v705_v19 }
  0xb0   :  { %v150_v59 = vpop.xlane.xlu0 %149 }
  0xb1   :  { %v177_v60 = vpop.xlane.xlu1 %176  ;;  %v249_v15 = vrot.slane %v150_v59, %v705_v19 }
  0xb2   :  { %v306_v26 = vrot.slane %v177_v60, %v253_v16 }
  0xb4   :  { %v153_v2 = vpop.xlane.xlu0 %152  ;;  %v307_v32 = vsel %vm255_vm1, %v306_v26, %v302_v7 }
  0xb5   :  { %v180_v52 = vpop.xlane.xlu1 %179  ;;  %v254_v28 = vrot.slane %v153_v2, %v253_v16 }
  0xb6   :  { %v311_v31 = vrot.slane %v180_v52, %v260_v18 }
  0xb7   :  { %v256_v45 = vsel %vm255_vm1, %v254_v28, %v249_v15 }
  0xb8   :  { %v156_v55 = vpop.xlane.xlu0 %155  ;;  %v312_v47 = vsel %vm262_vm2, %v311_v31, %v307_v32 }
  0xb9   :  { %v689_v9 = vpop.xlane.xlu1 %200  ;;  %v261_v38 = vrot.slane %v156_v55, %v260_v18 }
  0xba   :  { %v345_v49 = vrot.slane %v689_v9, %v253_v16 }
  0xbb   :  { %v263_v24 = vsel %vm262_vm2, %v261_v38, %v256_v45 }
  0xbc   :  { %v691_v11 = vpop.xlane.xlu0 %197 }
  0xbd   :  { %v183_v61 = vpop.xlane.xlu1 %182  ;;  %v341_v44 = vrot.slane %v691_v11, %v705_v19 }
  0xbe   :  { %v316_v41 = vrot.slane %v183_v61, %v267_v27 }
  0xbf   :  { %v346_v52 = vsel %vm255_vm1, %v345_v49, %v341_v44 }
  0xc0   :  { %v693_v62 = vpop.xlane.xlu0 %158  ;;  %v317_v39 = vsel %vm269_vm3, %v316_v41, %v312_v47 }
  0xc1   :  { %v695_v63 = vpop.xlane.xlu1 %161  ;;  %v268_v34 = vrot.slane %v693_v62, %v267_v27 }
  0xc2   :  { %v275_v51 = vrot.slane %v695_v63, %v274_v35 }
  0xc3   :  { %v270_v58 = vsel %vm269_vm3, %v268_v34, %v263_v24 }
  0xc4   :  { %v697_v12 = vpop.xlane.xlu0 %203  ;;  %v277_v55 = vsel %vm276_vm4, %v275_v51, %v270_v58 }
  0xc5   :  { %v699_v23 = vpop.xlane.xlu1 %206  ;;  %v350_v54 = vrot.slane %v697_v12, %v260_v18 }
  0xc6   :  { %v355_v1 = vrot.slane %v699_v23, %v267_v27 }
  0xc7   :  { %v351_v61 = vsel %vm262_vm2, %v350_v54, %v346_v52 }
  0xc8   :  { %v701_v8 = vpop.xlane.xlu0 %185  ;;  %v356_v4 = vsel %vm269_vm3, %v355_v1, %v351_v61 }
  0xc9   :  { %v703_v22 = vpop.xlane.xlu1 %188  ;;  %v321_v53 = vrot.slane %v701_v8, %v274_v35 }
  0xca   :  { %v326_v0 = vrot.slane %v703_v22, %v281_v36 }
  0xcb   :  { %v322_v9 = vsel %vm276_vm4, %v321_v53, %v317_v39 }
  0xcc   :  { %v165_v17 = vpop.xlane.xlu0 %164  ;;  %v327_v62 = vsel %vm283_vm5, %v326_v0, %v322_v9 }
  0xcd   :  { %v168_v13 = vpop.xlane.xlu1 %167  ;;  %v282_v37 = vrot.slane %v165_v17, %v281_v36 }
  0xce   :  { %v289_v50 = vrot.slane %v168_v13, %v288_v40 }
  0xcf   :  { %v284_v63 = vsel %vm283_vm5, %v282_v37, %v277_v55 }
  0xd0   :  { %v210_v29 = vpop.xlane.xlu0 %209  ;;  %v291_v12 = vsel %vm290_vm6, %v289_v50, %v284_v63 }
  0xd1   :  { %v213_v33 = vpop.xlane.xlu1 %212  ;;  %v360_v57 = vrot.slane %v210_v29, %v274_v35 }
  0xd2   :  { %v365_v11 = vrot.slane %v213_v33, %v281_v36 }
  0xd3   :  { %v361_v8 = vsel %vm276_vm4, %v360_v57, %v356_v4 }
  0xd4   :  { %v192_v43 = vpop.xlane.xlu0 %191  ;;  %v366_v16 = vsel %vm283_vm5, %v365_v11, %v361_v8 }
  0xd5   :  { %v195_v48 = vpop.xlane.xlu1 %194  ;;  %v331_v46 = vrot.slane %v192_v43, %v288_v40 }
  0xd6   :  { %v336_v59 = vrot.slane %v195_v48, %v295_v42 }
  0xd7   :  { %v332_v23 = vsel %vm290_vm6, %v331_v46, %v327_v62 }
  0xd8   :  { %v171_v56 = vpop.xlane.xlu0 %170  ;;  %v337_v10 = vsel %vm297_vm7, %v336_v59, %v332_v23 }
  0xd9   :  { %v296_v60 = vrot.slane %v171_v56, %v295_v42  ;;  %v219_v2 = vpop.xlane.xlu1 %218 }
  0xda   :  { %v375_v6 = vrot.slane %v219_v2, %v295_v42 }
  0xdb   :  { %v298_v22 = vsel %vm297_vm7, %v296_v60, %v291_v12 }
  0xdc   :  { %v216_v5 = vpop.xlane.xlu0 %215  ;;  %v378_v18 = vsel %vm377_vm8, %v337_v10, %v298_v22 }
  0xdd   :  { %v370_v14 = vrot.slane %v216_v5, %v288_v40 }
  0xdf   :  { %v371_v3 = vsel %vm290_vm6, %v370_v14, %v366_v16 }
  0xe0   :  { %v376_v17 = vsel %vm297_vm7, %v375_v6, %v371_v3 }
  0xe1   :  { %v380_v13 = vsel %vm379_vm9, %v376_v17, %v378_v18 }
  0xe2   :  { %v383_v21 = vsel %vm382_vm10, %v380_v13, 0.0 }
  0xe3   :  { %384 = vadd.xlane.f32.xlu0 %v383_v21 }
 0x16c   :  { %v385_v20 = vpop.xlane.xlu0 %384 }
 0x16d   :  { %v386_v25 = vmul.f32 0.03125, %v385_v20 }
 0x16f   :  { %v391_v26 = vrot.slane %v386_v25, %v705_v19 }
 0x171   :  { %394 = vst.msk [vmem:[#allocation2] sm:$0x1] %vm393_vm11, %v391_v26 }
 0x172   :  { %421 = shalt.err (!%p418_p4)
}
 0x173   :  { %404 = dma.vmem_to_hbm [thread:$0]  %s402_s25, 16, %s744_s1, [#allocation3]  }
 0x174   :  { %430 = dma.done.wait [#allocation3], 16  }
 0x175   :  { %431 = vsyncadd [#allocation3], 4294967280 }
 0x176   :  { %408 = vsyncpa [#allocation3], 1 }

</bundles_post_ra>
